<compile_context>
chip_gen: v7x
topology: tpu7x:2x2x1
jax: 0.10.0
libtpu: 0.0.40
codegen_flags: <defaults>
</compile_context>

<pallas_src>
import jax
import jax.numpy as jnp
from jax.experimental import pallas as pl
from jax.experimental.pallas import tpu as pltpu


def _fused_head_kernel(x_ref, w_ref, b_ref, o_ref):
    """One row-tile of the fused encoder+decoder scoring head.

    x_ref : (tm, E)  token features (compute dtype, e.g. bf16)
    w_ref : (E, N)   [w_enc | w_dec_0 @ Lab | ...]  (compute dtype, resident)
    b_ref : (1, N)   matching biases (f32, resident)
    o_ref : (tm, N)  fused scores out (cast at the store; f32 acc stays in VMEM)
    """
    acc = jnp.dot(x_ref[...], w_ref[...], preferred_element_type=jnp.float32)
    o_ref[...] = (acc + b_ref[...]).astype(o_ref.dtype)


def prepare_transfer_head(w_enc, b_enc, w_dec, b_dec, label_embeddings,
                          compute_dtype=jnp.bfloat16):
    """Fold + fuse the scoring-head parameters ONCE (hoisted out of forward).

    Returns a dict with:
      w_all : (E, N) compute_dtype   fused projection weights
      b_all : (1, N) float32         fused biases (kept f32 for accuracy)
      num_labels, num_decoders : python ints
    """
    f32 = jnp.float32
    L = w_enc.shape[1]
    nd = w_dec.shape[0]

    lab = label_embeddings.astype(f32)                              # (L, L)
    # General associativity fold, performed in f32 (works for non-diagonal
    # label embeddings too); only the *fused* weight is downcast afterwards.
    w_dec_f = jnp.einsum('del,lk->dek', w_dec.astype(f32), lab)     # (nd, E, L)
    b_dec_f = b_dec.astype(f32) @ lab                               # (nd, L)

    w_all = jnp.concatenate(
        [w_enc.astype(f32)] + [w_dec_f[d] for d in range(nd)], axis=1)       # (E, N)
    b_all = jnp.concatenate(
        [b_enc.astype(f32).reshape(1, L)]
        + [b_dec_f[d].reshape(1, L) for d in range(nd)], axis=1)             # (1, N)

    return {
        "w_all": w_all.astype(compute_dtype),
        "b_all": b_all,                      # bias stays f32 (tiny)
        "num_labels": int(L),
        "num_decoders": int(nd),
    }


def transfer_forward(features, lengths, head, *, tm=None, out_dtype=None):
    """JAX wrapper reproducing Transfer_Model.forward -> (enc_score, [dec_scores]).

    `head` is the output of `prepare_transfer_head` (prepared once, reused).
    """
    # TODO(synk): Encoder_Net / Decoder_Net internals (contextual encoder, use
    # of `lengths`, dropout p) are not provided; only the linear scoring heads
    # are implemented. Sequence-length masking is left to the caller.
    del lengths

    w_all = head["w_all"]
    b_all = head["b_all"]
    L = head["num_labels"]
    nd = head["num_decoders"]

    B, S, E = features.shape
    M = B * S
    N = (nd + 1) * L
    compute_dtype = w_all.dtype
    if out_dtype is None:
        out_dtype = compute_dtype            # 16-bit output by default

    # Features DMA'd in the compute dtype (bf16 by default -> half the x bytes,
    # native MXU dtype on all generations). No jnp.pad copy of x.
    x = features.reshape(M, E).astype(compute_dtype)

    # Row tiling: single step for tiny M; otherwise keep >= 2 grid steps so the
    # "parallel" axis can shard across v7x's 2 TensorCores; cap at 512 rows.
    if tm is None:
        if M <= 256:
            tm = M                                        # full-dim exception
        else:
            half = ((pl.cdiv(M, 2) + 7) // 8) * 8
            tm = min(512, half)
    grid_m = pl.cdiv(M, tm)                               # ragged last tile OK

    isz = lambda dt: jnp.dtype(dt).itemsize
    bytes_accessed = (M * E * isz(compute_dtype)          # read x
                      + E * N * isz(compute_dtype)        # read W_all (once)
                      + N * 4                             # read b_all
                      + M * N * isz(out_dtype))           # write scores
    flops = 2 * M * E * N

    # Explicit VMEM budget: 2x x-tile + resident W/b + 2x out-tile + f32 acc,
    # doubled for slack, floored at 16 MiB, capped below v7x physical 64 MiB.
    vmem_needed = (2 * tm * E * isz(compute_dtype)
                   + 2 * E * N * isz(compute_dtype)
                   + 2 * N * 4
                   + 2 * tm * N * isz(out_dtype)
                   + tm * N * 4)
    vmem_limit = int(min(64 * 1024 * 1024,
                         max(16 * 1024 * 1024, 2 * vmem_needed + (2 << 20))))

    out = pl.pallas_call(
        _fused_head_kernel,
        out_shape=jax.ShapeDtypeStruct((M, N), out_dtype),
        grid_spec=pltpu.PrefetchScalarGridSpec(
            num_scalar_prefetch=0,
            grid=(grid_m,),
            in_specs=[
                # x row-tile (pipelined)
                pl.BlockSpec((tm, E), lambda i: (i, 0)),
                # fused weights: constant index_map -> single resident buffer
                pl.BlockSpec((E, N), lambda i: (0, 0),
                             pipeline_mode=pl.Buffered(1)),
                # fused bias: resident, f32
                pl.BlockSpec((1, N), lambda i: (0, 0),
                             pipeline_mode=pl.Buffered(1)),
            ],
            # True-N output block (full-dim exception): masked stores, but
            # N x fewer HBM writeback bytes than padding N up to 128.
            out_specs=pl.BlockSpec((tm, N), lambda i: (i, 0)),
        ),
        compiler_params=pltpu.CompilerParams(
            dimension_semantics=("parallel",),
            vmem_limit_bytes=vmem_limit),
        cost_estimate=pl.CostEstimate(flops=flops, transcendentals=0,
                                      bytes_accessed=bytes_accessed),
    )(x, w_all, b_all)

    # Split the fused slab back into per-head scores (cheap layout plumbing,
    # half the bytes of the previous f32/padded version).
    encoder_score = out[:, :L].reshape(B, S, L)
    decoders_scores = [
        out[:, (d + 1) * L:(d + 2) * L].reshape(B, S, L) for d in range(nd)
    ]
    return encoder_score, decoders_scores


if __name__ == "__main__":
    # Small, deterministic problem sizes consistent with the module.
    B, S, E = 2, 8, 32          # batch, seq, embedding dim
    num_labels = 8              # len(tag_map)
    num_decoders = 1
    init_mu = 4.0

    key = jax.random.PRNGKey(0)
    k_feat, k_we, k_be, k_wd, k_bd = jax.random.split(key, 5)

    features = jax.random.normal(k_feat, (B, S, E), dtype=jnp.float32)
    lengths = jnp.full((B,), S, dtype=jnp.int32)

    w_enc = 0.1 * jax.random.normal(k_we, (E, num_labels), dtype=jnp.float32)
    b_enc = 0.1 * jax.random.normal(k_be, (num_labels,), dtype=jnp.float32)
    w_dec = 0.1 * jax.random.normal(
        k_wd, (num_decoders, E, num_labels), dtype=jnp.float32)
    b_dec = 0.1 * jax.random.normal(
        k_bd, (num_decoders, num_labels), dtype=jnp.float32)

    # label_embeddings = init_mu * eye(num_labels)  (as in __init__)
    label_embeddings = init_mu * jnp.eye(num_labels, dtype=jnp.float32)

    # ---- fast path: bf16 compute + bf16 output (head prepared ONCE) ----
    head_bf16 = prepare_transfer_head(
        w_enc, b_enc, w_dec, b_dec, label_embeddings,
        compute_dtype=jnp.bfloat16)
    enc_bf, dec_bf = transfer_forward(features, lengths, head_bf16)
    jax.block_until_ready((enc_bf, dec_bf))

    # ---- exact path: f32 compute + f32 output (for precision-critical use) ----
    head_f32 = prepare_transfer_head(
        w_enc, b_enc, w_dec, b_dec, label_embeddings,
        compute_dtype=jnp.float32)
    enc_f32, dec_f32 = transfer_forward(features, lengths, head_f32,
                                        out_dtype=jnp.float32)
    jax.block_until_ready((enc_f32, dec_f32))

    # Pure-JAX references (original, un-folded PyTorch formulation).
    x_flat = features.reshape(B * S, E)
    enc_ref = (x_flat @ w_enc + b_enc).reshape(B, S, num_labels)
    dec_ref = ((x_flat @ w_dec[0] + b_dec[0]) @ label_embeddings
               ).reshape(B, S, num_labels)

    # f32 path matches the reference tightly.
    assert enc_f32.dtype == jnp.float32
    assert jnp.allclose(enc_f32, enc_ref, atol=1e-5)
    assert jnp.allclose(dec_f32[0], dec_ref, atol=1e-5)

    # bf16 path: compare against a precision-matched reference (bf16 inputs,
    # f32 accumulation, bf16 output), plus a coarse semantic check vs f32 ref.
    xw_ref = (jnp.dot(x_flat.astype(jnp.bfloat16), head_bf16["w_all"],
                      preferred_element_type=jnp.float32)
              + head_bf16["b_all"]).astype(jnp.bfloat16)
    enc_bf_flat = enc_bf.astype(jnp.float32).reshape(B * S, num_labels)
    dec_bf_flat = dec_bf[0].astype(jnp.float32).reshape(B * S, num_labels)
    assert enc_bf.dtype == jnp.bfloat16
    assert jnp.allclose(enc_bf_flat,
                        xw_ref[:, :num_labels].astype(jnp.float32),
                        atol=2e-2, rtol=2e-2)
    assert jnp.allclose(dec_bf_flat,
                        xw_ref[:, num_labels:2 * num_labels].astype(jnp.float32),
                        atol=2e-2, rtol=2e-2)
    assert jnp.allclose(enc_bf.astype(jnp.float32), enc_ref, atol=0.1, rtol=0.1)

    assert enc_bf.shape == (B, S, num_labels)
    assert len(dec_bf) == num_decoders

    print("KERNEL_OK")
</pallas_src>

<mosaic_0001>
module attributes {stable_mosaic.version = 11 : i64} {
  func.func @_fused_head_kernel(%arg0: i32, %arg1: memref<16x32xbf16, #tpu.memory_space<vmem>>, %arg2: memref<32x16xbf16, #tpu.memory_space<vmem>>, %arg3: memref<1x16xf32, #tpu.memory_space<vmem>>, %arg4: memref<16x16xbf16, #tpu.memory_space<vmem>>) attributes {dimension_semantics = [#tpu.dimension_semantics<parallel>], iteration_bounds = array<i64: 1>, scalar_prefetch = 0 : i64, scratch_operands = 0 : i64, tpu.core_type = #tpu.core_type<tc>, window_params = [{transform_indices = @transform_0, window_bounds = array<i64: 16, 32>}, {pipeline_mode = #tpu.pipeline_mode<synchronous>, transform_indices = @transform_1, window_bounds = array<i64: 32, 16>}, {pipeline_mode = #tpu.pipeline_mode<synchronous>, transform_indices = @transform_2, window_bounds = array<i64: 1, 16>}, {transform_indices = @transform_3, window_bounds = array<i64: 16, 16>}]} {
    %c0 = arith.constant 0 : index
    %c0_0 = arith.constant 0 : index
    %0 = vector.load %arg1[%c0, %c0_0] : memref<16x32xbf16, #tpu.memory_space<vmem>>, vector<16x32xbf16>
    %c0_1 = arith.constant 0 : index
    %c0_2 = arith.constant 0 : index
    %1 = vector.load %arg2[%c0_1, %c0_2] : memref<32x16xbf16, #tpu.memory_space<vmem>>, vector<32x16xbf16>
    %cst = arith.constant dense<0.000000e+00> : vector<16x16xf32>
    %2 = tpu.matmul %0, %1, %cst {dimension_numbers = #tpu.dot_dimension_numbers<[1], [0], [0], [1], [0, 0, 1, 1], [], []>} : vector<16x32xbf16>, vector<32x16xbf16>, vector<16x16xf32> -> vector<16x16xf32>
    %c0_3 = arith.constant 0 : index
    %c0_4 = arith.constant 0 : index
    %3 = vector.load %arg3[%c0_3, %c0_4] : memref<1x16xf32, #tpu.memory_space<vmem>>, vector<1x16xf32>
    %4 = vector.broadcast %3 : vector<1x16xf32> to vector<16x16xf32>
    %5 = arith.addf %2, %4 : vector<16x16xf32>
    %6 = arith.truncf %5 : vector<16x16xf32> to vector<16x16xbf16>
    %c0_5 = arith.constant 0 : index
    %c0_6 = arith.constant 0 : index
    %7 = vector.load %arg4[%c0_5, %c0_6] : memref<16x16xbf16, #tpu.memory_space<vmem>>, vector<16x16xbf16>
    tpu.vector_store %arg4[%c0_5, %c0_6], %6 {strides = array<i32>} : memref<16x16xbf16, #tpu.memory_space<vmem>>, vector<16x16xbf16>,
    return
  }
  func.func @transform_0(%arg0: i32) -> (i32, i32) {
    %c0_i32 = arith.constant 0 : i32
    %c0_i32_0 = arith.constant 0 : i32
    return %arg0, %c0_i32 : i32, i32
  }
  func.func @transform_1(%arg0: i32) -> (i32, i32) {
    %c0_i32 = arith.constant 0 : i32
    %c0_i32_0 = arith.constant 0 : i32
    %c0_i32_1 = arith.constant 0 : i32
    return %c0_i32, %c0_i32_0 : i32, i32
  }
  func.func @transform_2(%arg0: i32) -> (i32, i32) {
    %c0_i32 = arith.constant 0 : i32
    %c0_i32_0 = arith.constant 0 : i32
    %c0_i32_1 = arith.constant 0 : i32
    return %c0_i32, %c0_i32_0 : i32, i32
  }
  func.func @transform_3(%arg0: i32) -> (i32, i32) {
    %c0_i32 = arith.constant 0 : i32
    %c0_i32_0 = arith.constant 0 : i32
    return %arg0, %c0_i32 : i32, i32
  }
}

</mosaic_0001>

<bundles_post_ra>
// kernel: tpu_custom_call.1
= control target key start
LH: loop header
LB: loop body
LE: loop exit
PB: predicated region body
PF: predicated region fallthrough
CT: control target
= control target key end

     0   :  { %v170_v1 = vmov 0.0   ;;  %vm171_vm0 = vmmov 0   ;;  %s219_s0 = inlined_call_operand.vmem [shape: bf16[16,32], index: 0, kind: input, shape index: {}]   ;;  %s220_s1 = inlined_call_operand.vmem [shape: bf16[32,16], index: 1, kind: input, shape index: {}]   ;;  %s221_s2 = inlined_call_operand.vmem [shape: f32[1,16], index: 2, kind: input, shape index: {}]   ;;  %s222_s3 = inlined_call_operand.hbm [shape: bf16[16,16], index: 3, kind: output, shape index: {}]  }
   0x1   :  { %v143_v0 = vld [vmem:[%s220_s1] sm:$0xff]   ;;  %130 = vmatprep.subr.bf16.mxu0 %v170_v1  ;;  %v144_v2 = vld [vmem:[%s220_s1 + $0x8] sm:$0xff]   ;;  %134 = vmatprep.mubr.msk.bf16.mxu0 %vm171_vm0, %v170_v1 }
   0x2   :  { %131 = vmatpush3.bf16.msra.mxu0 %v143_v0 }
   0x3   :  { %132 = vmatprep.subr.bf16.mxu0 %v170_v1 }
   0x4   :  { %8 = vsyncpa [#allocation3], 0  ;;  %v145_v3 = vld [vmem:[%s219_s0] sm:$0xff]   ;;  %vm46_vm1 = vcmask 261120   ;;  %s172_s20 = smov [#allocation2]   ;;  %vm99_vm2 = vcmask 125952  }
   0x5   :  { %v118_v4 = vld [vmem:[%s221_s2] ss:$0 sm:$0xff]  ;;  %s107_s1 = sshll.u32 %s172_s20, 4  ;;  %s108_s1 = int_to_ptr.vmem [resolvable:$true] %s107_s1 }
   0x6   :  { %133 = vmatpush3.bf16.msra.mxu0 %v144_v2  ;;  %s146_s0 = scalar_lea.vmem %s108_s1, 128  ;;  %p151_p1 = scmp.lt.s32.totalorder %s108_s1, %s108_s1 }
   0x7   :  { %p147_p0 = scmp.ne.s32.totalorder %s108_s1, %s146_s0  ;;  %p152_p2 = scmp.lt.s32.totalorder %s146_s0, %s146_s0 }
   0x9   :  { %135 = vmatmul.mubr.msk.bf16.vlgmr.msra.gmra.mrb[0].mxu0 %vm46_vm1, %v145_v3  ;;  %p153_p3 = por %p152_p2, %p151_p1 }
   0xb   :  { %p154_p4 = pnand %p153_p3, %p147_p0 }
  0xdc   :  { %v84_v5 = vpop.f32.mrb[0].mxu0 }
  0xdd   :  { %v85_v6 = vadd.f32 %v118_v4, %v84_v5  ;;  %v136_v7 = vpop.f32.mrb[1].mxu0 }
  0xde   :  { %v87_v8 = vpop.f32.mrb[2].mxu0 }
  0xdf   :  { %v125_v9 = vpack.c.bf16 %v85_v6, %v85_v6  ;;  %v88_v10 = vadd.f32 %v118_v4, %v87_v8  ;;  %v137_v11 = vpop.f32.mrb[3].mxu0 }
  0xe1   :  { %100 = vst.msk [vmem:[#allocation2] sm:$0xf] %vm99_vm2, %v125_v9  ;;  %v126_v12 = vpack.c.bf16 %v88_v10, %v88_v10 }
  0xe3   :  { %101 = vst.msk [vmem:[#allocation2 + $0x4] sm:$0xf] %vm99_vm2, %v126_v12 }
  0xe4   :  { %157 = shalt.err (!%p154_p4)
}
  0xe5   :  { %s158_s22 = scalar_lea.hbm %s222_s3, 128 }
  0xe6   :  { %p159_p5 = scmp.ne.s32.totalorder %s222_s3, %s158_s22  ;;  %p162_p6 = scmp.lt.u32.totalorder %s158_s22, %s222_s3 }
  0xe8   :  { %p164_p7 = pnand %p162_p6, %p159_p5 }
  0xea   :  { %167 = shalt.err (!%p164_p7)
}
  0xeb   :  { %s173_s27 = smov 64   ;;  %s174_s28 = smov 4  }
  0xec   :  { %113 = dma.vmem_to_hbm [thread:$0]  %s108_s1, 128, %s222_s3, [#allocation3], %s173_s27, %s173_s27, %s174_s28  }
  0xed   :  { %168 = dma.done.wait [#allocation3], 128  }
  0xee   :  { %169 = vsyncadd [#allocation3], 4294967168 }
  0xef   :  { %117 = vsyncpa [#allocation3], 1 }

</bundles_post_ra>
